<compile_context>
chip_gen: v6e
topology: v6e:2x2x1
jax: 0.10.0
libtpu: 0.0.40
codegen_flags: <defaults>
</compile_context>

<pallas_src>
import functools

import jax
import jax.numpy as jnp
from jax.experimental import pallas as pl
from jax.experimental.pallas import tpu as pltpu


def _masked_sum_kernel(h_ref, m_ref, o_ref, acc_ref, *,
                       seq_len, s_tile, ragged, precision):
    """One (batch-tile b, hidden-tile j, seq-tile k) grid step of the masked sum.

    h_ref:   (b_tile, s_tile, h_tile)  last_hidden_state tile (native dtype, no upcast)
    m_ref:   (b_tile, 1, s_tile)       attention-mask tile (pre-cast to h dtype)
    o_ref:   (b_tile, 1, h_tile)       masked-sum output tile (f32), resident across k
    acc_ref: (b_tile, 1, h_tile) f32   running masked sum of embeddings
    """
    k = pl.program_id(2)

    @pl.when(k == 0)
    def _():
        acc_ref[...] = jnp.zeros_like(acc_ref)

    h = h_ref[...]
    if ragged:
        # The last sequence tile overhangs the (unpadded) activation array; the
        # overhang rows of the VMEM buffer are undefined, so select-zero them.
        # (A multiply by the zero mask is NOT enough: stale NaN * 0 == NaN.)
        rows = jax.lax.broadcasted_iota(jnp.int32, (1, h.shape[1], 1), 1)
        h = jnp.where(rows + k * s_tile < seq_len, h, jnp.zeros_like(h))

    m = m_ref[...]                           # (b_tile, 1, s_tile), 0/1 in h dtype

    # Masked sequence-sum as a lane-dense MXU mat-vec per batch row, f32 accumulate.
    acc_ref[...] += jnp.einsum(
        'bqs,bsh->bqh', m, h,
        preferred_element_type=jnp.float32, precision=precision)

    @pl.when(k == pl.num_programs(2) - 1)
    def _():
        o_ref[...] = acc_ref[...].astype(o_ref.dtype)


def mean_pooling_pallas(last_hidden_state, attention_mask, *,
                        tile_budget_bytes=6 * 1024 * 1024):
    """feature = MeanPooling(last_hidden_state, attention_mask).

    last_hidden_state: [B, S, H] (any float dtype; bf16 stays bf16 in HBM/VMEM)
    attention_mask:    [B, S]    (int or float)
    returns:           [B, H]    float32 (matches PyTorch promotion: h * mask.float())
    """
    B, S, H = last_hidden_state.shape
    dtype = last_hidden_state.dtype
    itemsize = jnp.dtype(dtype).itemsize

    # ---- hidden-dim tile (H is never padded; HF hidden sizes are 128-multiples) ---
    if H % 128 == 0 and H > 2048:
        h_tile = 2048
        while H % h_tile:
            h_tile -= 128
    else:
        h_tile = H
    n_h = H // h_tile
    # v7x megacore: when batch alone cannot occupy both TensorCores, split H so each
    # core streams a disjoint hidden slice (harmless on single-TC v5e/v6e).
    if B == 1 and n_h == 1 and H % 256 == 0 and H >= 1024:
        h_tile, n_h = H // 2, 2

    # ---- sequence tile from the VMEM byte budget (double-buffered input ~2x budget) -
    s_rows = max(8, tile_budget_bytes // (h_tile * itemsize))
    if s_rows >= S:
        s_tile, n_s, ragged = S, 1, False
    else:
        s_tile = max(128, (s_rows // 128) * 128)
        ragged = (S % s_tile) != 0
        if ragged:
            # Prefer a tile that divides S exactly (skips the ragged-tail select)
            # if one exists within 2x of the budget.
            d = s_tile - 128
            while d >= max(128, s_tile // 2):
                if S % d == 0:
                    s_tile, ragged = d, False
                    break
                d -= 128
        n_s = -(-S // s_tile)

    # ---- batch tile: short-sequence path packs several rows into one big DMA ------
    b_tile = 1
    if n_s == 1:
        step_bytes = max(1, S * h_tile * itemsize)
        b_tile = max(1, min(B, tile_budget_bytes // step_bytes))
        while B % b_tile:
            b_tile -= 1
    n_b = B // b_tile

    # ---- operands: activations are NEVER padded/copied; only the tiny mask is -----
    m = attention_mask.astype(dtype).reshape(B, 1, S)
    s_pad = n_s * s_tile
    if s_pad != S:
        m = jnp.pad(m, ((0, 0), (0, 0), (0, s_pad - S)))

    # f32 activations need the multi-pass MXU algorithm to hold ~f32 accuracy;
    # bf16 uses the default single-pass bf16 x bf16 -> f32 path.
    precision = jax.lax.Precision.HIGHEST if itemsize >= 4 else None

    kernel = functools.partial(_masked_sum_kernel, seq_len=S, s_tile=s_tile,
                               ragged=ragged, precision=precision)

    cost = pl.CostEstimate(
        flops=2 * B * S * H, transcendentals=0,
        bytes_accessed=B * S * H * itemsize + B * s_pad * itemsize + B * H * 4)

    pooled = pl.pallas_call(
        kernel,
        out_shape=jax.ShapeDtypeStruct((B, 1, H), jnp.float32),
        grid_spec=pltpu.PrefetchScalarGridSpec(
            num_scalar_prefetch=0,
            grid=(n_b, n_h, n_s),
            in_specs=[
                pl.BlockSpec((b_tile, s_tile, h_tile), lambda b, j, k: (b, k, j)),
                pl.BlockSpec((b_tile, 1, s_tile), lambda b, j, k: (b, 0, k)),
            ],
            out_specs=pl.BlockSpec((b_tile, 1, h_tile), lambda b, j, k: (b, 0, j)),
            scratch_shapes=[pltpu.VMEM((b_tile, 1, h_tile), jnp.float32)],
        ),
        compiler_params=pltpu.CompilerParams(
            dimension_semantics=("parallel", "parallel", "arbitrary"),
            vmem_limit_bytes=32 * 1024 * 1024),
        cost_estimate=cost,
    )(last_hidden_state, m)

    # Denominator (sum of mask, clamped at 1e-9 like torch.clamp) is a tiny [B]
    # XLA reduction; keeping it out of the kernel leaves the inner loop DMA-only.
    denom = jnp.maximum(jnp.sum(attention_mask.astype(jnp.float32), axis=1), 1e-9)
    return pooled.reshape(B, H) / denom[:, None]


def mean_pooling_ref(last_hidden_state, attention_mask):
    """Pure-JAX reference mirroring the PyTorch MeanPooling module."""
    m = attention_mask.astype(jnp.float32)[..., None]
    m = jnp.broadcast_to(m, last_hidden_state.shape)
    sum_emb = jnp.sum(last_hidden_state.astype(jnp.float32) * m, axis=1)
    sum_mask = jnp.maximum(jnp.sum(m, axis=1), 1e-9)
    return sum_emb / sum_mask


class CustomModelPallas:
    """Mirror of CustomModel: holds fc (hidden_size -> 1) params initialized as in
    _init_weights, but forward() (like the PyTorch module) only returns the pooled
    feature (fc / fc_dropout are unused in CustomModel.forward)."""

    def __init__(self, hidden_size, initializer_range=0.02, seed=0):
        key = jax.random.PRNGKey(seed)
        self.fc_weight = initializer_range * jax.random.normal(
            key, (1, hidden_size), dtype=jnp.float32)
        self.fc_bias = jnp.zeros((1,), dtype=jnp.float32)

    def forward(self, last_hidden_state, attention_mask):
        # TODO(synk): the HF AutoModel backbone producing last_hidden_state is external.
        return mean_pooling_pallas(last_hidden_state, attention_mask)


if __name__ == "__main__":
    key = jax.random.PRNGKey(0)
    k1, k2, k3 = jax.random.split(key, 3)

    # ---- toy shapes implied by the module: batch=2, seq=8, hidden=32 ------------
    B, S, H = 2, 8, 32
    last_hidden_state = jax.random.normal(k1, (B, S, H), dtype=jnp.float32)
    lengths = jnp.array([8, 5], dtype=jnp.int32)
    attention_mask = (jnp.arange(S)[None, :] < lengths[:, None]).astype(jnp.int32)

    model = CustomModelPallas(hidden_size=H)
    feature = jax.block_until_ready(model.forward(last_hidden_state, attention_mask))
    ref = mean_pooling_ref(last_hidden_state, attention_mask)
    assert feature.shape == (B, H), feature.shape
    assert jnp.allclose(feature, ref, atol=1e-5, rtol=1e-5), (
        "Pallas mean pooling mismatch vs reference (f32)")

    # ---- bf16 activation path: no f32 upcast in-kernel, f32 MXU accumulation ----
    h_bf16 = last_hidden_state.astype(jnp.bfloat16)
    feat_bf16 = jax.block_until_ready(mean_pooling_pallas(h_bf16, attention_mask))
    ref_bf16 = mean_pooling_ref(h_bf16, attention_mask)
    assert jnp.allclose(feat_bf16, ref_bf16, atol=2e-2, rtol=2e-2), (
        "Pallas mean pooling mismatch vs reference (bf16)")

    # ---- tiled + ragged sequence path (no padded copy of the activations): force a
    # small tile budget so S=200 splits into a 128-row tile + a ragged 72-row tail.
    B2, S2, H2 = 2, 200, 128
    h2 = jax.random.normal(k2, (B2, S2, H2), dtype=jnp.float32)
    len2 = jnp.array([200, 77], dtype=jnp.int32)
    mask2 = (jnp.arange(S2)[None, :] < len2[:, None]).astype(jnp.int32)
    out2 = jax.block_until_ready(
        mean_pooling_pallas(h2, mask2, tile_budget_bytes=128 * 128 * 4))
    ref2 = mean_pooling_ref(h2, mask2)
    assert jnp.allclose(out2, ref2, atol=1e-5, rtol=1e-5), (
        "Pallas mean pooling mismatch vs reference (ragged seq tiles)")

    # ---- hidden-split (megacore) path: B == 1 splits H over a parallel grid axis --
    B3, S3, H3 = 1, 64, 1024
    h3 = jax.random.normal(k3, (B3, S3, H3), dtype=jnp.float32)
    len3 = jnp.array([40], dtype=jnp.int32)
    mask3 = (jnp.arange(S3)[None, :] < len3[:, None]).astype(jnp.int32)
    out3 = jax.block_until_ready(mean_pooling_pallas(h3, mask3))
    ref3 = mean_pooling_ref(h3, mask3)
    assert jnp.allclose(out3, ref3, atol=1e-5, rtol=1e-5), (
        "Pallas mean pooling mismatch vs reference (hidden split)")

    print("KERNEL_OK")
</pallas_src>

<mosaic_0001>
module attributes {stable_mosaic.version = 11 : i64} {
  func.func @_masked_sum_kernel(%arg0: i32, %arg1: i32, %arg2: i32, %arg3: memref<2x8x32xf32, #tpu.memory_space<vmem>>, %arg4: memref<2x1x8xf32, #tpu.memory_space<vmem>>, %arg5: memref<2x1x32xf32, #tpu.memory_space<vmem>>, %arg6: memref<2x1x32xf32, #tpu.memory_space<vmem>>) attributes {dimension_semantics = [#tpu.dimension_semantics<parallel>, #tpu.dimension_semantics<parallel>, #tpu.dimension_semantics<arbitrary>], iteration_bounds = array<i64: 1, 1, 1>, scalar_prefetch = 0 : i64, scratch_operands = 1 : i64, tpu.core_type = #tpu.core_type<tc>, window_params = [{transform_indices = @transform_0, window_bounds = array<i64: 2, 8, 32>}, {transform_indices = @transform_1, window_bounds = array<i64: 2, 1, 8>}, {transform_indices = @transform_2, window_bounds = array<i64: 2, 1, 32>}]} {
    %c0_i32 = arith.constant 0 : i32
    %0 = arith.cmpi eq, %arg2, %c0_i32 : i32
    %1 = arith.extui %0 : i1 to i32
    %c0_i32_0 = arith.constant 0 : i32
    %2 = arith.cmpi ne, %1, %c0_i32_0 : i32
    scf.if %2 {
      %cst_14 = arith.constant 0.000000e+00 : f32
      %12 = vector.broadcast %cst_14 : f32 to vector<2x1x32xf32>
      %c0_15 = arith.constant 0 : index
      %c0_16 = arith.constant 0 : index
      %c0_17 = arith.constant 0 : index
      %13 = vector.load %arg6[%c0_15, %c0_16, %c0_17] : memref<2x1x32xf32, #tpu.memory_space<vmem>>, vector<2x1x32xf32>
      tpu.vector_store %arg6[%c0_15, %c0_16, %c0_17], %12 {strides = array<i32>} : memref<2x1x32xf32, #tpu.memory_space<vmem>>, vector<2x1x32xf32>,
    } else {
    }
    %c0 = arith.constant 0 : index
    %c0_1 = arith.constant 0 : index
    %c0_2 = arith.constant 0 : index
    %3 = vector.load %arg3[%c0, %c0_1, %c0_2] : memref<2x8x32xf32, #tpu.memory_space<vmem>>, vector<2x8x32xf32>
    %c0_3 = arith.constant 0 : index
    %c0_4 = arith.constant 0 : index
    %c0_5 = arith.constant 0 : index
    %4 = vector.load %arg4[%c0_3, %c0_4, %c0_5] : memref<2x1x8xf32, #tpu.memory_space<vmem>>, vector<2x1x8xf32>
    %c0_6 = arith.constant 0 : index
    %c0_7 = arith.constant 0 : index
    %c0_8 = arith.constant 0 : index
    %5 = vector.load %arg6[%c0_6, %c0_7, %c0_8] : memref<2x1x32xf32, #tpu.memory_space<vmem>>, vector<2x1x32xf32>
    "tpu.trace_start"() <{level = 10 : i32, message = "bqs,bsh->bqh"}> : () -> ()
    %cst = arith.constant dense<0.000000e+00> : vector<2x1x32xf32>
    %6 = tpu.matmul %4, %3, %cst {dimension_numbers = #tpu.dot_dimension_numbers<[2], [1], [1], [2], [0, 0, 0, 1, 1, 2], [0], [0]>, precision = #tpu.contract_precision<fp32>} : vector<2x1x8xf32>, vector<2x8x32xf32>, vector<2x1x32xf32> -> vector<2x1x32xf32>
    "tpu.trace_stop"() : () -> ()
    %7 = arith.addf %5, %6 : vector<2x1x32xf32>
    %c0_9 = arith.constant 0 : index
    %c0_10 = arith.constant 0 : index
    %c0_11 = arith.constant 0 : index
    %8 = vector.load %arg6[%c0_9, %c0_10, %c0_11] : memref<2x1x32xf32, #tpu.memory_space<vmem>>, vector<2x1x32xf32>
    tpu.vector_store %arg6[%c0_9, %c0_10, %c0_11], %7 {strides = array<i32>} : memref<2x1x32xf32, #tpu.memory_space<vmem>>, vector<2x1x32xf32>,
    %c0_i32_12 = arith.constant 0 : i32
    %9 = arith.cmpi eq, %arg2, %c0_i32_12 : i32
    %10 = arith.extui %9 : i1 to i32
    %c0_i32_13 = arith.constant 0 : i32
    %11 = arith.cmpi ne, %10, %c0_i32_13 : i32
    scf.if %11 {
      %c0_14 = arith.constant 0 : index
      %c0_15 = arith.constant 0 : index
      %c0_16 = arith.constant 0 : index
      %12 = vector.load %arg6[%c0_14, %c0_15, %c0_16] : memref<2x1x32xf32, #tpu.memory_space<vmem>>, vector<2x1x32xf32>
      %c0_17 = arith.constant 0 : index
      %c0_18 = arith.constant 0 : index
      %c0_19 = arith.constant 0 : index
      %13 = vector.load %arg5[%c0_17, %c0_18, %c0_19] : memref<2x1x32xf32, #tpu.memory_space<vmem>>, vector<2x1x32xf32>
      tpu.vector_store %arg5[%c0_17, %c0_18, %c0_19], %12 {strides = array<i32>} : memref<2x1x32xf32, #tpu.memory_space<vmem>>, vector<2x1x32xf32>,
    } else {
    }
    return
  }
  func.func @transform_0(%arg0: i32, %arg1: i32, %arg2: i32) -> (i32, i32, i32) {
    %c0_i32 = arith.constant 0 : i32
    return %arg0, %arg2, %arg1 : i32, i32, i32
  }
  func.func @transform_1(%arg0: i32, %arg1: i32, %arg2: i32) -> (i32, i32, i32) {
    %c0_i32 = arith.constant 0 : i32
    %c0_i32_0 = arith.constant 0 : i32
    return %arg0, %c0_i32, %arg2 : i32, i32, i32
  }
  func.func @transform_2(%arg0: i32, %arg1: i32, %arg2: i32) -> (i32, i32, i32) {
    %c0_i32 = arith.constant 0 : i32
    %c0_i32_0 = arith.constant 0 : i32
    return %arg0, %c0_i32, %arg1 : i32, i32, i32
  }
}

</mosaic_0001>

<bundles_post_ra>
// kernel: tpu_custom_call.1
= control target key start
LH: loop header
LB: loop body
LE: loop exit
PB: predicated region body
PF: predicated region fallthrough
CT: control target
= control target key end

     0   :  { %7 = vsyncpa [#allocation4], 0  ;;  %s1224_s0 = inlined_call_operand.hbm [shape: f32[2,8,32], index: 0, kind: input, shape index: {}]   ;;  %s1225_s1 = inlined_call_operand.hbm [shape: f32[2,1,8], index: 1, kind: input, shape index: {}]   ;;  %s1226_s2 = inlined_call_operand.hbm [shape: f32[2,1,32], index: 2, kind: output, shape index: {}]  }
   0x1   :  { %8 = vsyncpa [#allocation7], 0 }
   0x2   :  { %9 = vsyncpa [#allocation5], 0  ;;  %s1141_s9 = smov [#allocation3]  }
   0x3   :  { %s15_s10 = sshll.u32 %s1141_s9, 4  ;;  %s16_s10 = int_to_ptr.vmem [resolvable:$true] %s15_s10 }
   0x4   :  { %s1083_s11 = scalar_lea.vmem %s16_s10, 256  ;;  %p1088_p1 = scmp.lt.s32.totalorder %s16_s10, %s16_s10 }
   0x5   :  { %p1084_p0 = scmp.ne.s32.totalorder %s16_s10, %s1083_s11  ;;  %p1089_p2 = scmp.lt.s32.totalorder %s1083_s11, %s1083_s11 }
   0x7   :  { %p1090_p3 = por %p1089_p2, %p1088_p1 }
   0x9   :  { %p1091_p4 = pnand %p1090_p3, %p1084_p0 }
   0xb   :  { %1094 = shalt.err (!%p1091_p4)
}
   0xc   :  { %s1142_s12 = smov 128   ;;  %s1143_s13 = smov 8  }
   0xd   :  { %21 = dma.hbm_to_vmem [thread:$0]  %s1224_s0, 256, %s16_s10, [#allocation4], %s1142_s12, %s1142_s12, %s1143_s13  }
   0xe   :  { %s1144_s16 = smov [#allocation6]  }
   0xf   :  { %s27_s17 = sshll.u32 %s1144_s16, 4  ;;  %s28_s17 = int_to_ptr.vmem [resolvable:$true] %s27_s17 }
  0x10   :  { %s1103_s18 = scalar_lea.vmem %s28_s17, 32  ;;  %p1108_p6 = scmp.lt.s32.totalorder %s28_s17, %s28_s17 }
  0x11   :  { %p1104_p5 = scmp.ne.s32.totalorder %s28_s17, %s1103_s18  ;;  %p1109_p7 = scmp.lt.s32.totalorder %s1103_s18, %s1103_s18 }
  0x13   :  { %p1110_p8 = por %p1109_p7, %p1108_p6 }
  0x15   :  { %p1111_p9 = pnand %p1110_p8, %p1104_p5 }
  0x17   :  { %1114 = shalt.err (!%p1111_p9)
}
  0x18   :  { %s1145_s19 = smov 16   ;;  %s1146_s20 = smov 1  }
  0x19   :  { %33 = dma.hbm_to_vmem [thread:$0]  %s1225_s1, 32, %s28_s17, [#allocation7], %s1145_s19, %s1145_s19, %s1146_s20  }
  0x1a   :  { %1135 = dma.done.wait [#allocation4], 256  }
  0x1b   :  { %1136 = vsyncadd [#allocation4], 4294967040 }
  0x1c   :  { %1137 = dma.done.wait [#allocation7], 32  }
  0x1d   :  { %1138 = vsyncadd [#allocation7], 4294967264  ;;  %v1147_v0 = vmov 0.0   ;;  %vm1148_vm0 = vmmov 0   ;;  %vm53_vm1 = vcmask 64512   ;;  %v47_v1 = vld [vmem:[#allocation3] sm:$0xff] }
  0x1e   :  { %1006 = vmatprep.subr.mxu0 %v1147_v0  ;;  %1011 = vmatprep.subr.mxu1 %v1147_v0  ;;  %v49_v2 = vld [vmem:[#allocation6] sm:$0x1]  ;;  %v50_v3 = vld [vmem:[#allocation6 + $0x1] sm:$0x1]  ;;  %v88_v4 = vand.u32 4294901760, %v47_v1  ;;  %v48_v7 = vld [vmem:[#allocation3 + $0x8] sm:$0xff] }
  0x1f   :  { %1008 = vmatprep.mubr.msk.f32.mxu0 %vm1148_vm0, %v1147_v0  ;;  %1013 = vmatprep.mubr.msk.f32.mxu1 %vm1148_vm0, %v1147_v0  ;;  %v55_v5 = vsel %vm53_vm1, %v49_v2, 0  ;;  %v504_v6 = vsel %vm53_vm1, %v50_v3, 0  ;;  %v537_v9 = vand.u32 4294901760, %v48_v7  ;;  %vm44_vm2 = vcmask 253952   ;;  %s1149_s0 = smov [#allocation8]  }
  0x20   :  { %v123_v8 = vand.u32 4294901760, %v55_v5  ;;  %1007 = vmatpush3.msra.mxu0 %v88_v4  ;;  %v165_v10 = vsub.f32 %v47_v1, %v88_v4  ;;  %v572_v12 = vand.u32 4294901760, %v504_v6  ;;  %45 = vst.msk [vmem:[#allocation2] sm:$0x1] %vm44_vm2, %v1147_v0  ;;  %46 = vst.msk [vmem:[#allocation2 + $0x1] sm:$0x1] %vm44_vm2, %v1147_v0 }
  0x21   :  { %1016 = vmatprep.subr.mxu0 %v1147_v0  ;;  %v614_v15 = vsub.f32 %v48_v7, %v537_v9  ;;  %s969_s1 = sshll.u32 %s1149_s0, 4  ;;  %s970_s1 = int_to_ptr.vmem [resolvable:$true] %s969_s1 }
  0x22   :  { %v124_v11 = vsub.f32 %v55_v5, %v123_v8  ;;  %v166_v13 = vand.u32 4294901760, %v165_v10  ;;  %v573_v18 = vsub.f32 %v504_v6, %v572_v12  ;;  %s1115_s23 = scalar_lea.vmem %s970_s1, 32  ;;  %p1120_p11 = scmp.lt.s32.totalorder %s970_s1, %s970_s1 }
  0x23   :  { %v615_v21 = vand.u32 4294901760, %v614_v15  ;;  %p1116_p10 = scmp.ne.s32.totalorder %s970_s1, %s1115_s23  ;;  %p1121_p12 = scmp.lt.s32.totalorder %s1115_s23, %s1115_s23 }
  0x24   :  { %v125_v14 = vand.u32 4294901760, %v124_v11  ;;  %v167_v16 = vsub.f32 %v165_v10, %v166_v13  ;;  %v574_v22 = vand.u32 4294901760, %v573_v18 }
  0x25   :  { %v616_v23 = vsub.f32 %v614_v15, %v615_v21  ;;  %p1122_p13 = por %p1121_p12, %p1120_p11 }
  0x26   :  { %v126_v17 = vsub.f32 %v124_v11, %v125_v14  ;;  %v168_v19 = vand.u32 4294901760, %v167_v16  ;;  %v575_v24 = vsub.f32 %v573_v18, %v574_v22 }
  0x27   :  { %v617_v25 = vand.u32 4294901760, %v616_v23  ;;  %v51_v41 = vld [vmem:[#allocation2] sm:$0x1]  ;;  %v52_v60 = vld [vmem:[#allocation2 + $0x1] sm:$0x1]  ;;  %p1123_p0 = pnand %p1122_p13, %p1116_p10 }
  0x28   :  { %v127_v20 = vand.u32 4294901760, %v126_v17  ;;  %1012 = vmatpush3.msra.mxu1 %v168_v19  ;;  %v576_v26 = vand.u32 4294901760, %v575_v24 }
  0x29   :  { %1014 = vmatmul.mubr.f32.vlgmr.msra.gmra.mxu1 %v123_v8  ;;  %1021 = vmatprep.subr.mxu1 %v1147_v0 }
  0x2a   :  { %1009 = vmatmul.mubr.f32.vlgmr.msra.gmra.mxu0 %v127_v20  ;;  %1022 = vmatpush3.msra.mxu1 %v88_v4 }
  0x2b   :  { %1017 = vmatpush3.msra.mxu0 %v165_v10  ;;  %1018 = vmatprep.mubr.msk.f32.mxu0 %vm1148_vm0, %v1147_v0 }
  0x2c   :  { %1023 = vmatprep.mubr.msk.f32.mxu1 %vm1148_vm0, %v1147_v0  ;;  %1026 = vmatprep.subr.mxu0 %v1147_v0 }
  0x2d   :  { %1024 = vmatmul.mubr.f32.vlgmr.msra.gmra.mxu1 %v125_v14  ;;  %1031 = vmatprep.subr.mxu1 %v1147_v0 }
  0x2e   :  { %1019 = vmatmul.mubr.f32.vlgmr.msra.gmra.mxu0 %v124_v11  ;;  %1032 = vmatpush3.msra.mxu1 %v88_v4 }
  0x2f   :  { %1027 = vmatpush3.msra.mxu0 %v166_v13  ;;  %1028 = vmatprep.mubr.msk.f32.mxu0 %vm1148_vm0, %v1147_v0 }
  0x30   :  { %1033 = vmatprep.mubr.msk.f32.mxu1 %vm1148_vm0, %v1147_v0  ;;  %1036 = vmatprep.subr.mxu0 %v1147_v0 }
  0x31   :  { %1034 = vmatmul.mubr.f32.vlgmr.msra.gmra.mxu1 %v123_v8  ;;  %1041 = vmatprep.subr.mxu1 %v1147_v0 }
  0x32   :  { %1029 = vmatmul.mubr.f32.vlgmr.msra.gmra.mxu0 %v123_v8  ;;  %1042 = vmatpush3.msra.mxu1 %v617_v25 }
  0x33   :  { %1037 = vmatpush3.msra.mxu0 %v537_v9  ;;  %1038 = vmatprep.mubr.msk.f32.mxu0 %vm1148_vm0, %v1147_v0 }
  0x34   :  { %1043 = vmatprep.mubr.msk.f32.mxu1 %vm1148_vm0, %v1147_v0  ;;  %1046 = vmatprep.subr.mxu0 %v1147_v0 }
  0x35   :  { %1044 = vmatmul.mubr.f32.vlgmr.msra.gmra.mxu1 %v572_v12  ;;  %1051 = vmatprep.subr.mxu1 %v1147_v0 }
  0x36   :  { %1039 = vmatmul.mubr.f32.vlgmr.msra.gmra.mxu0 %v576_v26  ;;  %1052 = vmatpush3.msra.mxu1 %v537_v9 }
  0x37   :  { %1047 = vmatpush3.msra.mxu0 %v614_v15  ;;  %1048 = vmatprep.mubr.msk.f32.mxu0 %vm1148_vm0, %v1147_v0 }
  0x38   :  { %1053 = vmatprep.mubr.msk.f32.mxu1 %vm1148_vm0, %v1147_v0  ;;  %1056 = vmatprep.subr.mxu0 %v1147_v0 }
  0x39   :  { %1054 = vmatmul.mubr.f32.vlgmr.msra.gmra.mxu1 %v574_v22  ;;  %1061 = vmatprep.subr.mxu1 %v1147_v0 }
  0x3a   :  { %1049 = vmatmul.mubr.f32.vlgmr.msra.gmra.mxu0 %v573_v18  ;;  %1062 = vmatpush3.msra.mxu1 %v537_v9 }
  0x3b   :  { %1057 = vmatpush3.msra.mxu0 %v615_v21  ;;  %1058 = vmatprep.mubr.msk.f32.mxu0 %vm1148_vm0, %v1147_v0 }
  0x3c   :  { %1063 = vmatprep.mubr.msk.f32.mxu1 %vm1148_vm0, %v1147_v0 }
  0x3d   :  { %1064 = vmatmul.mubr.f32.vlgmr.msra.gmra.mxu1 %v572_v12 }
  0x3e   :  { %1059 = vmatmul.mubr.f32.vlgmr.msra.gmra.mxu0 %v572_v12 }
  0xe9   :  { %v205_v28 = vpop.f32.mrf.mxu1 }
  0xea   :  { %v129_v27 = vpop.f32.mrf.mxu0 }
  0xeb   :  { %v1015_v30 = vpop.f32.mrf.mxu1  ;;  %v206_v31 = vadd.f32 %v205_v28, %v129_v27 }
  0xec   :  { %v1010_v29 = vpop.f32.mrf.mxu0 }
  0xed   :  { %v353_v33 = vpop.f32.mrf.mxu1 }
  0xee   :  { %v279_v32 = vpop.f32.mrf.mxu0 }
  0xef   :  { %v280_v34 = vadd.f32 %v279_v32, %v206_v31  ;;  %v1025_v36 = vpop.f32.mrf.mxu1 }
  0xf0   :  { %v1020_v35 = vpop.f32.mrf.mxu0 }
  0xf1   :  { %v354_v37 = vadd.f32 %v353_v33, %v280_v34  ;;  %v499_v39 = vpop.f32.mrf.mxu1 }
  0xf2   :  { %v427_v38 = vpop.f32.mrf.mxu0 }
  0xf3   :  { %v428_v40 = vadd.f32 %v427_v38, %v354_v37  ;;  %v1035_v43 = vpop.f32.mrf.mxu1 }
  0xf4   :  { %v1030_v42 = vpop.f32.mrf.mxu0 }
  0xf5   :  { %v500_v44 = vadd.f32 %v499_v39, %v428_v40  ;;  %v654_v46 = vpop.f32.mrf.mxu1 }
  0xf6   :  { %v578_v45 = vpop.f32.mrf.mxu0 }
  0xf7   :  { %v952_v47 = vadd.f32 %v500_v44, %v51_v41  ;;  %v1045_v49 = vpop.f32.mrf.mxu1  ;;  %v655_v50 = vadd.f32 %v654_v46, %v578_v45 }
  0xf8   :  { %v1040_v48 = vpop.f32.mrf.mxu0 }
  0xf9   :  { %955 = vst.msk [vmem:[#allocation2] sm:$0x1] %vm44_vm2, %v952_v47  ;;  %v802_v52 = vpop.f32.mrf.mxu1 }
  0xfa   :  { %v728_v51 = vpop.f32.mrf.mxu0 }
  0xfb   :  { %v729_v53 = vadd.f32 %v728_v51, %v655_v50  ;;  %v1055_v55 = vpop.f32.mrf.mxu1 }
  0xfc   :  { %v1050_v54 = vpop.f32.mrf.mxu0 }
  0xfd   :  { %v803_v56 = vadd.f32 %v802_v52, %v729_v53  ;;  %v948_v58 = vpop.f32.mrf.mxu1 }
  0xfe   :  { %v876_v57 = vpop.f32.mrf.mxu0 }
  0xff   :  { %v877_v59 = vadd.f32 %v876_v57, %v803_v56  ;;  %v1065_v62 = vpop.f32.mrf.mxu1 }
 0x100   :  { %v1060_v61 = vpop.f32.mrf.mxu0  ;;  %v960_v63 = vld [vmem:[#allocation2] sm:$0x1] }
 0x101   :  { %v949_v0 = vadd.f32 %v948_v58, %v877_v59  ;;  %962 = vst.msk [vmem:[#allocation8] sm:$0x1] %vm44_vm2, %v960_v63 }
 0x103   :  { %v953_v1 = vadd.f32 %v949_v0, %v52_v60 }
 0x105   :  { %956 = vst.msk [vmem:[#allocation2 + $0x1] sm:$0x1] %vm44_vm2, %v953_v1 }
 0x10c   :  { %v961_v2 = vld [vmem:[#allocation2 + $0x1] sm:$0x1] }
 0x10d   :  { %963 = vst.msk [vmem:[#allocation8 + $0x1] sm:$0x1] %vm44_vm2, %v961_v2 }
 0x10e   :  { %1126 = shalt.err (!%p1123_p0)
}
 0x10f   :  { %975 = dma.vmem_to_hbm [thread:$0]  %s970_s1, 32, %s1226_s2, [#allocation5], %s1145_s19, %s1145_s19, %s1146_s20  }
 0x110   :  { %1139 = dma.done.wait [#allocation5], 32  }
 0x111   :  { %1140 = vsyncadd [#allocation5], 4294967264 }
 0x112   :  { %979 = vsyncpa [#allocation4], 1 }
 0x113   :  { %980 = vsyncpa [#allocation7], 1 }
 0x114   :  { %981 = vsyncpa [#allocation5], 1 }

</bundles_post_ra>
